<compile_context>
chip_gen: v6e
topology: v6e:2x2x1
jax: 0.10.0
libtpu: 0.0.40
codegen_flags: <defaults>
</compile_context>

<pallas_src>
import functools

import jax
import jax.numpy as jnp
from jax.experimental import pallas as pl
from jax.experimental.pallas import tpu as pltpu


# ----------------------------------------------------------------------------
# helpers
# ----------------------------------------------------------------------------
def _round_up(x, m):
    return ((x + m - 1) // m) * m


def _choose_tiling(n_nodes):
    """Pad node count for lane/tile alignment and pick an A_hat row tile so the
    double-buffered bf16 row tile stays under ~8 MiB (v7x-friendly)."""
    n_pad = _round_up(max(n_nodes, 128), 128)
    if n_pad <= 512:
        return n_pad, n_pad                       # single tile, grid = (1,)
    tile = 512
    while tile > 8 and (n_pad % tile != 0
                        or 2 * 2 * tile * n_pad > 8 * 1024 * 1024):
        tile //= 2
    return n_pad, tile


def _stable_sigmoid(x):
    # exp only of non-positive arguments -> never overflows
    z = jnp.exp(-jnp.abs(x))
    return jnp.where(x >= 0, 1.0 / (1.0 + z), z / (1.0 + z))


# ----------------------------------------------------------------------------
# Pallas kernels
# ----------------------------------------------------------------------------
def _encoder_kernel(nc_pad, ne_pad,
                    corner_ref, conn_ref,
                    wce_ref, bce_ref, wne_ref, bne_ref,
                    x_ref):
    """corner_encoder / connection_encoder + axis-0 concat into one padded X."""
    f32 = jnp.float32
    cx = jnp.maximum(
        jnp.dot(corner_ref[...], wce_ref[...], preferred_element_type=f32)
        + bce_ref[...], 0.0)
    nx = jnp.maximum(
        jnp.dot(conn_ref[...], wne_ref[...], preferred_element_type=f32)
        + bne_ref[...], 0.0)
    # zero the whole buffer first so grid-padding rows are well defined
    # (they are multiplied by zero A_hat columns downstream; must not be NaN).
    x_ref[...] = jnp.zeros_like(x_ref)
    x_ref[0:nc_pad, :] = cx.astype(x_ref.dtype)
    x_ref[nc_pad:nc_pad + ne_pad, :] = nx.astype(x_ref.dtype)


def _gcn_layer_kernel(a_ref, h_ref, w_ref, b_ref, o_ref):
    """One GCNConv layer on one A_hat row tile: out = (A_hat_tile @ H) @ W + b."""
    f32 = jnp.float32
    agg = jnp.dot(a_ref[...], h_ref[...], preferred_element_type=f32)
    out = jnp.dot(agg.astype(jnp.bfloat16), w_ref[...],
                  preferred_element_type=f32) + b_ref[...]
    o_ref[...] = out.astype(o_ref.dtype)


def _heads_kernel(nc_pad, ne_pad,
                  h_ref,
                  wc1_ref, bc1_ref, wc2_ref, bc2_ref,
                  wn1_ref, bn1_ref, wn2_ref, bn2_ref,
                  o_ref):
    """Fused corner / connection prediction heads + sigmoid, one output buffer."""
    f32 = jnp.float32

    def head(h, w1, b1, w2_row, b2):
        hid = jnp.maximum(
            jnp.dot(h, w1, preferred_element_type=f32) + b1, 0.0)
        # 32 -> 1 projection as a VPU multiply + lane reduction (no MXU pass)
        logit = jnp.sum(hid * w2_row, axis=-1, keepdims=True) + b2
        return _stable_sigmoid(logit)

    hc = h_ref[0:nc_pad, :].astype(f32)
    hn = h_ref[nc_pad:nc_pad + ne_pad, :].astype(f32)

    o_ref[...] = jnp.zeros_like(o_ref)
    o_ref[0:nc_pad, :] = head(hc, wc1_ref[...], bc1_ref[...],
                              wc2_ref[...], bc2_ref[...])
    o_ref[nc_pad:nc_pad + ne_pad, :] = head(hn, wn1_ref[...], bn1_ref[...],
                                            wn2_ref[...], bn2_ref[...])


# ----------------------------------------------------------------------------
# Glue: normalized adjacency (O(E) scatter), parameter init, pallas_call wrap
# ----------------------------------------------------------------------------
def _build_normalized_adjacency(edge_index, edge_weight, nc, ne, nc_pad, n_pad):
    """Dense A_hat = D^-1/2 (A + I) D^-1/2 (PyG gcn_norm semantics), built
    already normalized at scatter time (no extra O(N^2) scaling passes)."""
    src = edge_index[0].astype(jnp.int32)
    dst = edge_index[1].astype(jnp.int32)
    # remap connection-node ids into the sublane-padded node layout
    src = jnp.where(src >= nc, src - nc + nc_pad, src)
    dst = jnp.where(dst >= nc, dst - nc + nc_pad, dst)
    ew = edge_weight.astype(jnp.float32).reshape(-1)

    node_ids = jnp.arange(n_pad, dtype=jnp.int32)
    real = (node_ids < nc) | ((node_ids >= nc_pad) & (node_ids < nc_pad + ne))

    deg = jnp.zeros((n_pad,), jnp.float32).at[dst].add(ew)
    deg = deg + real.astype(jnp.float32)                    # self-loop weight 1
    d_inv_sqrt = jnp.where(deg > 0, jax.lax.rsqrt(deg), 0.0)

    vals = d_inv_sqrt[dst] * ew * d_inv_sqrt[src]
    a_hat = jnp.zeros((n_pad, n_pad), jnp.float32).at[dst, src].add(vals)
    a_hat = a_hat.at[node_ids, node_ids].add(d_inv_sqrt * d_inv_sqrt)
    return a_hat.astype(jnp.bfloat16)


def _linear_params(key, fan_in, fan_out):
    """PyTorch nn.Linear default init: U(-1/sqrt(fan_in), 1/sqrt(fan_in))."""
    kw, kb = jax.random.split(key)
    bound = 1.0 / jnp.sqrt(jnp.float32(fan_in))
    w = jax.random.uniform(kw, (fan_in, fan_out), jnp.float32, -bound, bound)
    b = jax.random.uniform(kb, (1, fan_out), jnp.float32, -bound, bound)
    return w, b


def init_params(key):
    keys = jax.random.split(key, 9)
    p = {}
    p["wce"], p["bce"] = _linear_params(keys[0], 3, 32)     # corner_encoder
    p["wne"], p["bne"] = _linear_params(keys[1], 5, 32)     # connection_encoder
    p["w1"], p["b1"] = _linear_params(keys[2], 32, 64)      # conv_1 (GCN lin)
    p["w2"], p["b2"] = _linear_params(keys[3], 64, 64)      # conv_2
    p["w3"], p["b3"] = _linear_params(keys[4], 64, 64)      # conv_3
    p["wcp1"], p["bcp1"] = _linear_params(keys[5], 64, 32)  # corner_pred[0]
    p["wcp2"], p["bcp2"] = _linear_params(keys[6], 32, 1)   # corner_pred[2]
    p["wnp1"], p["bnp1"] = _linear_params(keys[7], 64, 32)  # connection_pred[0]
    p["wnp2"], p["bnp2"] = _linear_params(keys[8], 32, 1)   # connection_pred[2]
    return p


def _gcn_layer(a_hat, h, w_bf16, b, tile_r):
    """Row-tiled, megacore-parallel (A_hat @ H) @ W + b."""
    n_pad = a_hat.shape[0]
    f_in = h.shape[1]
    f_out = w_bf16.shape[1]
    grid = (n_pad // tile_r,)

    flops = 2 * n_pad * n_pad * f_in + 2 * n_pad * f_in * f_out
    bytes_accessed = (a_hat.size * 2 + h.size * 2
                      + w_bf16.size * 2 + b.size * 4 + n_pad * f_out * 2)

    return pl.pallas_call(
        _gcn_layer_kernel,
        out_shape=jax.ShapeDtypeStruct((n_pad, f_out), jnp.bfloat16),
        grid=grid,
        in_specs=[
            pl.BlockSpec((tile_r, n_pad), lambda i: (i, 0)),  # A_hat row tile
            pl.BlockSpec((n_pad, f_in), lambda i: (0, 0)),    # H (resident)
            pl.BlockSpec((f_in, f_out), lambda i: (0, 0)),    # W (resident)
            pl.BlockSpec((1, f_out), lambda i: (0, 0)),       # bias
        ],
        out_specs=pl.BlockSpec((tile_r, f_out), lambda i: (i, 0)),
        compiler_params=pltpu.CompilerParams(
            dimension_semantics=("parallel",)),
        cost_estimate=pl.CostEstimate(
            flops=int(flops), transcendentals=0,
            bytes_accessed=int(bytes_accessed)),
    )(a_hat, h, w_bf16, b)


@jax.jit
def graph_model_forward(corners, connections, edge_index, edge_attr, params):
    # NOTE: distinct (num_corners, num_connections, num_edges) re-specializes.
    nc, ne = corners.shape[0], connections.shape[0]
    nc_pad = _round_up(nc, 8)
    ne_pad = _round_up(ne, 8)
    n_pad, tile_r = _choose_tiling(nc_pad + ne_pad)

    f32, bf16 = jnp.float32, jnp.bfloat16

    # torch.cat([corners, zeros(len, 1)], dim=-1), padded to (nc_pad, 3)
    corner_in = jnp.zeros((nc_pad, 3), f32).at[:nc, :2].set(corners.astype(f32))
    conn_in = jnp.zeros((ne_pad, 5), f32).at[:ne, :].set(connections.astype(f32))

    a_hat = _build_normalized_adjacency(edge_index, edge_attr,
                                        nc, ne, nc_pad, n_pad)

    vmem = pl.BlockSpec(memory_space=pltpu.MemorySpace.VMEM)

    # ---- encoders: x = cat([relu(c Wc + bc), relu(n Wn + bn)], 0) ----------
    x = pl.pallas_call(
        functools.partial(_encoder_kernel, nc_pad, ne_pad),
        out_shape=jax.ShapeDtypeStruct((n_pad, 32), bf16),
        in_specs=[vmem] * 6,
        out_specs=vmem,
    )(corner_in, conn_in,
      params["wce"], params["bce"], params["wne"], params["bne"])

    # ---- three GCNConv layers (no nonlinearity between, as in forward) -----
    h = _gcn_layer(a_hat, x, params["w1"].astype(bf16), params["b1"], tile_r)
    h = _gcn_layer(a_hat, h, params["w2"].astype(bf16), params["b2"], tile_r)
    h = _gcn_layer(a_hat, h, params["w3"].astype(bf16), params["b3"], tile_r)

    # ---- fused prediction heads + sigmoid -----------------------------------
    out = pl.pallas_call(
        functools.partial(_heads_kernel, nc_pad, ne_pad),
        out_shape=jax.ShapeDtypeStruct((n_pad, 1), f32),
        in_specs=[vmem] * 9,
        out_specs=vmem,
    )(h,
      params["wcp1"], params["bcp1"], params["wcp2"].reshape(1, -1), params["bcp2"],
      params["wnp1"], params["bnp1"], params["wnp2"].reshape(1, -1), params["bnp2"])

    # .view(-1) on each head's rows
    corner_pred = out[:nc, 0]
    connection_pred = out[nc_pad:nc_pad + ne, 0]
    return corner_pred, connection_pred


if __name__ == "__main__":
    key = jax.random.PRNGKey(0)
    k_param, k_c, k_n, k_ei, k_ew = jax.random.split(key, 5)

    num_corners = 8
    num_connections = 8
    num_nodes = num_corners + num_connections
    num_edges = 24

    params = init_params(k_param)

    corners = jax.random.uniform(k_c, (num_corners, 2), jnp.float32)
    connections = jax.random.uniform(k_n, (num_connections, 5), jnp.float32)
    edge_index = jax.random.randint(k_ei, (2, num_edges), 0, num_nodes,
                                    dtype=jnp.int32)
    # edge_attr used as GCN edge weights (positive scalars per edge)
    edge_attr = jax.random.uniform(k_ew, (num_edges,), jnp.float32, 0.1, 1.0)

    corner_pred, connection_pred = graph_model_forward(
        corners, connections, edge_index, edge_attr, params)
    jax.block_until_ready((corner_pred, connection_pred))

    assert corner_pred.shape == (num_corners,)
    assert connection_pred.shape == (num_connections,)
    assert bool(jnp.all(jnp.isfinite(corner_pred)))
    assert bool(jnp.all(jnp.isfinite(connection_pred)))
    print("KERNEL_OK")
</pallas_src>

<mosaic_0001>
module attributes {stable_mosaic.version = 11 : i64} {
  func.func private @main(%arg0: i32) attributes {dimension_semantics = [#tpu.dimension_semantics<core_parallel>], iteration_bounds = array<i64: 2>, tpu.core_type = #tpu.core_type<sc_scalar_subcore>, window_params = []} {
    return
  }
}

module attributes {stable_mosaic.version = 11 : i64} {
  func.func private @main(%arg0: i32) attributes {dimension_semantics = [#tpu.dimension_semantics<core_parallel>], iteration_bounds = array<i64: 2>, tpu.core_type = #tpu.core_type<sc_scalar_subcore>, window_params = []} {
    return
  }
}

module attributes {stable_mosaic.version = 11 : i64} {
  func.func @_encoder_kernel(%arg0: memref<8x3xf32, #tpu.memory_space<vmem>>, %arg1: memref<8x5xf32, #tpu.memory_space<vmem>>, %arg2: memref<3x32xf32, #tpu.memory_space<vmem>>, %arg3: memref<1x32xf32, #tpu.memory_space<vmem>>, %arg4: memref<5x32xf32, #tpu.memory_space<vmem>>, %arg5: memref<1x32xf32, #tpu.memory_space<vmem>>, %arg6: memref<128x32xbf16, #tpu.memory_space<vmem>>) attributes {dimension_semantics = [], scalar_prefetch = 0 : i64, scratch_operands = 0 : i64, tpu.core_type = #tpu.core_type<tc>} {
    %c0 = arith.constant 0 : index
    %c0_0 = arith.constant 0 : index
    %0 = vector.load %arg0[%c0, %c0_0] : memref<8x3xf32, #tpu.memory_space<vmem>>, vector<8x3xf32>
    %c0_1 = arith.constant 0 : index
    %c0_2 = arith.constant 0 : index
    %1 = vector.load %arg2[%c0_1, %c0_2] : memref<3x32xf32, #tpu.memory_space<vmem>>, vector<3x32xf32>
    %cst = arith.constant dense<0.000000e+00> : vector<8x32xf32>
    %2 = tpu.matmul %0, %1, %cst {dimension_numbers = #tpu.dot_dimension_numbers<[1], [0], [0], [1], [0, 0, 1, 1], [], []>} : vector<8x3xf32>, vector<3x32xf32>, vector<8x32xf32> -> vector<8x32xf32>
    %c0_3 = arith.constant 0 : index
    %c0_4 = arith.constant 0 : index
    %3 = vector.load %arg3[%c0_3, %c0_4] : memref<1x32xf32, #tpu.memory_space<vmem>>, vector<1x32xf32>
    %4 = vector.broadcast %3 : vector<1x32xf32> to vector<8x32xf32>
    %5 = arith.addf %2, %4 : vector<8x32xf32>
    %cst_5 = arith.constant 0.000000e+00 : f32
    %6 = vector.broadcast %cst_5 : f32 to vector<8x32xf32>
    %7 = arith.maximumf %5, %6 : vector<8x32xf32>
    %c0_6 = arith.constant 0 : index
    %c0_7 = arith.constant 0 : index
    %8 = vector.load %arg1[%c0_6, %c0_7] : memref<8x5xf32, #tpu.memory_space<vmem>>, vector<8x5xf32>
    %c0_8 = arith.constant 0 : index
    %c0_9 = arith.constant 0 : index
    %9 = vector.load %arg4[%c0_8, %c0_9] : memref<5x32xf32, #tpu.memory_space<vmem>>, vector<5x32xf32>
    %cst_10 = arith.constant dense<0.000000e+00> : vector<8x32xf32>
    %10 = tpu.matmul %8, %9, %cst_10 {dimension_numbers = #tpu.dot_dimension_numbers<[1], [0], [0], [1], [0, 0, 1, 1], [], []>} : vector<8x5xf32>, vector<5x32xf32>, vector<8x32xf32> -> vector<8x32xf32>
    %c0_11 = arith.constant 0 : index
    %c0_12 = arith.constant 0 : index
    %11 = vector.load %arg5[%c0_11, %c0_12] : memref<1x32xf32, #tpu.memory_space<vmem>>, vector<1x32xf32>
    %12 = vector.broadcast %11 : vector<1x32xf32> to vector<8x32xf32>
    %13 = arith.addf %10, %12 : vector<8x32xf32>
    %cst_13 = arith.constant 0.000000e+00 : f32
    %14 = vector.broadcast %cst_13 : f32 to vector<8x32xf32>
    %15 = arith.maximumf %13, %14 : vector<8x32xf32>
    %cst_14 = arith.constant 0.000000e+00 : bf16
    %16 = vector.broadcast %cst_14 : bf16 to vector<128x32xbf16>
    %c0_15 = arith.constant 0 : index
    %c0_16 = arith.constant 0 : index
    %17 = vector.load %arg6[%c0_15, %c0_16] : memref<128x32xbf16, #tpu.memory_space<vmem>>, vector<128x32xbf16>
    tpu.vector_store %arg6[%c0_15, %c0_16], %16 {strides = array<i32>} : memref<128x32xbf16, #tpu.memory_space<vmem>>, vector<128x32xbf16>,
    %18 = arith.truncf %7 : vector<8x32xf32> to vector<8x32xbf16>
    %c0_17 = arith.constant 0 : index
    %c0_18 = arith.constant 0 : index
    %19 = vector.load %arg6[%c0_17, %c0_18] : memref<128x32xbf16, #tpu.memory_space<vmem>>, vector<8x32xbf16>
    tpu.vector_store %arg6[%c0_17, %c0_18], %18 {strides = array<i32>} : memref<128x32xbf16, #tpu.memory_space<vmem>>, vector<8x32xbf16>,
    %20 = arith.truncf %15 : vector<8x32xf32> to vector<8x32xbf16>
    %c8 = arith.constant 8 : index
    %c0_19 = arith.constant 0 : index
    %21 = vector.load %arg6[%c8, %c0_19] : memref<128x32xbf16, #tpu.memory_space<vmem>>, vector<8x32xbf16>
    tpu.vector_store %arg6[%c8, %c0_19], %20 {strides = array<i32>} : memref<128x32xbf16, #tpu.memory_space<vmem>>, vector<8x32xbf16>,
    return
  }
}

module attributes {stable_mosaic.version = 11 : i64} {
  func.func @_gcn_layer_kernel(%arg0: i32, %arg1: memref<128x128xbf16, #tpu.memory_space<vmem>>, %arg2: memref<128x32xbf16, #tpu.memory_space<vmem>>, %arg3: memref<32x64xbf16, #tpu.memory_space<vmem>>, %arg4: memref<1x64xf32, #tpu.memory_space<vmem>>, %arg5: memref<128x64xbf16, #tpu.memory_space<vmem>>) attributes {dimension_semantics = [#tpu.dimension_semantics<parallel>], iteration_bounds = array<i64: 1>, scalar_prefetch = 0 : i64, scratch_operands = 0 : i64, tpu.core_type = #tpu.core_type<tc>, window_params = [{transform_indices = @transform_0, window_bounds = array<i64: 128, 128>}, {pipeline_mode = #tpu.pipeline_mode<synchronous>, transform_indices = @transform_1, window_bounds = array<i64: 128, 32>}, {pipeline_mode = #tpu.pipeline_mode<synchronous>, transform_indices = @transform_2, window_bounds = array<i64: 32, 64>}, {pipeline_mode = #tpu.pipeline_mode<synchronous>, transform_indices = @transform_3, window_bounds = array<i64: 1, 64>}, {transform_indices = @transform_4, window_bounds = array<i64: 128, 64>}]} {
    %c0 = arith.constant 0 : index
    %c0_0 = arith.constant 0 : index
    %0 = vector.load %arg1[%c0, %c0_0] : memref<128x128xbf16, #tpu.memory_space<vmem>>, vector<128x128xbf16>
    %c0_1 = arith.constant 0 : index
    %c0_2 = arith.constant 0 : index
    %1 = vector.load %arg2[%c0_1, %c0_2] : memref<128x32xbf16, #tpu.memory_space<vmem>>, vector<128x32xbf16>
    %cst = arith.constant dense<0.000000e+00> : vector<128x32xf32>
    %2 = tpu.matmul %0, %1, %cst {dimension_numbers = #tpu.dot_dimension_numbers<[1], [0], [0], [1], [0, 0, 1, 1], [], []>} : vector<128x128xbf16>, vector<128x32xbf16>, vector<128x32xf32> -> vector<128x32xf32>
    %3 = arith.truncf %2 : vector<128x32xf32> to vector<128x32xbf16>
    %c0_3 = arith.constant 0 : index
    %c0_4 = arith.constant 0 : index
    %4 = vector.load %arg3[%c0_3, %c0_4] : memref<32x64xbf16, #tpu.memory_space<vmem>>, vector<32x64xbf16>
    %cst_5 = arith.constant dense<0.000000e+00> : vector<128x64xf32>
    %5 = tpu.matmul %3, %4, %cst_5 {dimension_numbers = #tpu.dot_dimension_numbers<[1], [0], [0], [1], [0, 0, 1, 1], [], []>} : vector<128x32xbf16>, vector<32x64xbf16>, vector<128x64xf32> -> vector<128x64xf32>
    %c0_6 = arith.constant 0 : index
    %c0_7 = arith.constant 0 : index
    %6 = vector.load %arg4[%c0_6, %c0_7] : memref<1x64xf32, #tpu.memory_space<vmem>>, vector<1x64xf32>
    %7 = vector.broadcast %6 : vector<1x64xf32> to vector<128x64xf32>
    %8 = arith.addf %5, %7 : vector<128x64xf32>
    %9 = arith.truncf %8 : vector<128x64xf32> to vector<128x64xbf16>
    %c0_8 = arith.constant 0 : index
    %c0_9 = arith.constant 0 : index
    %10 = vector.load %arg5[%c0_8, %c0_9] : memref<128x64xbf16, #tpu.memory_space<vmem>>, vector<128x64xbf16>
    tpu.vector_store %arg5[%c0_8, %c0_9], %9 {strides = array<i32>} : memref<128x64xbf16, #tpu.memory_space<vmem>>, vector<128x64xbf16>,
    return
  }
  func.func @transform_0(%arg0: i32) -> (i32, i32) {
    %c0_i32 = arith.constant 0 : i32
    %c0_i32_0 = arith.constant 0 : i32
    return %arg0, %c0_i32 : i32, i32
  }
  func.func @transform_1(%arg0: i32) -> (i32, i32) {
    %c0_i32 = arith.constant 0 : i32
    %c0_i32_0 = arith.constant 0 : i32
    %c0_i32_1 = arith.constant 0 : i32
    return %c0_i32, %c0_i32_0 : i32, i32
  }
  func.func @transform_2(%arg0: i32) -> (i32, i32) {
    %c0_i32 = arith.constant 0 : i32
    %c0_i32_0 = arith.constant 0 : i32
    %c0_i32_1 = arith.constant 0 : i32
    return %c0_i32, %c0_i32_0 : i32, i32
  }
  func.func @transform_3(%arg0: i32) -> (i32, i32) {
    %c0_i32 = arith.constant 0 : i32
    %c0_i32_0 = arith.constant 0 : i32
    %c0_i32_1 = arith.constant 0 : i32
    return %c0_i32, %c0_i32_0 : i32, i32
  }
  func.func @transform_4(%arg0: i32) -> (i32, i32) {
    %c0_i32 = arith.constant 0 : i32
    %c0_i32_0 = arith.constant 0 : i32
    return %arg0, %c0_i32 : i32, i32
  }
}

module attributes {stable_mosaic.version = 11 : i64} {
  func.func @_gcn_layer_kernel(%arg0: i32, %arg1: memref<128x128xbf16, #tpu.memory_space<vmem>>, %arg2: memref<128x64xbf16, #tpu.memory_space<vmem>>, %arg3: memref<64x64xbf16, #tpu.memory_space<vmem>>, %arg4: memref<1x64xf32, #tpu.memory_space<vmem>>, %arg5: memref<128x64xbf16, #tpu.memory_space<vmem>>) attributes {dimension_semantics = [#tpu.dimension_semantics<parallel>], iteration_bounds = array<i64: 1>, scalar_prefetch = 0 : i64, scratch_operands = 0 : i64, tpu.core_type = #tpu.core_type<tc>, window_params = [{transform_indices = @transform_0, window_bounds = array<i64: 128, 128>}, {pipeline_mode = #tpu.pipeline_mode<synchronous>, transform_indices = @transform_1, window_bounds = array<i64: 128, 64>}, {pipeline_mode = #tpu.pipeline_mode<synchronous>, transform_indices = @transform_2, window_bounds = array<i64: 64, 64>}, {pipeline_mode = #tpu.pipeline_mode<synchronous>, transform_indices = @transform_3, window_bounds = array<i64: 1, 64>}, {transform_indices = @transform_4, window_bounds = array<i64: 128, 64>}]} {
    %c0 = arith.constant 0 : index
    %c0_0 = arith.constant 0 : index
    %0 = vector.load %arg1[%c0, %c0_0] : memref<128x128xbf16, #tpu.memory_space<vmem>>, vector<128x128xbf16>
    %c0_1 = arith.constant 0 : index
    %c0_2 = arith.constant 0 : index
    %1 = vector.load %arg2[%c0_1, %c0_2] : memref<128x64xbf16, #tpu.memory_space<vmem>>, vector<128x64xbf16>
    %cst = arith.constant dense<0.000000e+00> : vector<128x64xf32>
    %2 = tpu.matmul %0, %1, %cst {dimension_numbers = #tpu.dot_dimension_numbers<[1], [0], [0], [1], [0, 0, 1, 1], [], []>} : vector<128x128xbf16>, vector<128x64xbf16>, vector<128x64xf32> -> vector<128x64xf32>
    %3 = arith.truncf %2 : vector<128x64xf32> to vector<128x64xbf16>
    %c0_3 = arith.constant 0 : index
    %c0_4 = arith.constant 0 : index
    %4 = vector.load %arg3[%c0_3, %c0_4] : memref<64x64xbf16, #tpu.memory_space<vmem>>, vector<64x64xbf16>
    %cst_5 = arith.constant dense<0.000000e+00> : vector<128x64xf32>
    %5 = tpu.matmul %3, %4, %cst_5 {dimension_numbers = #tpu.dot_dimension_numbers<[1], [0], [0], [1], [0, 0, 1, 1], [], []>} : vector<128x64xbf16>, vector<64x64xbf16>, vector<128x64xf32> -> vector<128x64xf32>
    %c0_6 = arith.constant 0 : index
    %c0_7 = arith.constant 0 : index
    %6 = vector.load %arg4[%c0_6, %c0_7] : memref<1x64xf32, #tpu.memory_space<vmem>>, vector<1x64xf32>
    %7 = vector.broadcast %6 : vector<1x64xf32> to vector<128x64xf32>
    %8 = arith.addf %5, %7 : vector<128x64xf32>
    %9 = arith.truncf %8 : vector<128x64xf32> to vector<128x64xbf16>
    %c0_8 = arith.constant 0 : index
    %c0_9 = arith.constant 0 : index
    %10 = vector.load %arg5[%c0_8, %c0_9] : memref<128x64xbf16, #tpu.memory_space<vmem>>, vector<128x64xbf16>
    tpu.vector_store %arg5[%c0_8, %c0_9], %9 {strides = array<i32>} : memref<128x64xbf16, #tpu.memory_space<vmem>>, vector<128x64xbf16>,
    return
  }
  func.func @transform_0(%arg0: i32) -> (i32, i32) {
    %c0_i32 = arith.constant 0 : i32
    %c0_i32_0 = arith.constant 0 : i32
    return %arg0, %c0_i32 : i32, i32
  }
  func.func @transform_1(%arg0: i32) -> (i32, i32) {
    %c0_i32 = arith.constant 0 : i32
    %c0_i32_0 = arith.constant 0 : i32
    %c0_i32_1 = arith.constant 0 : i32
    return %c0_i32, %c0_i32_0 : i32, i32
  }
  func.func @transform_2(%arg0: i32) -> (i32, i32) {
    %c0_i32 = arith.constant 0 : i32
    %c0_i32_0 = arith.constant 0 : i32
    %c0_i32_1 = arith.constant 0 : i32
    return %c0_i32, %c0_i32_0 : i32, i32
  }
  func.func @transform_3(%arg0: i32) -> (i32, i32) {
    %c0_i32 = arith.constant 0 : i32
    %c0_i32_0 = arith.constant 0 : i32
    %c0_i32_1 = arith.constant 0 : i32
    return %c0_i32, %c0_i32_0 : i32, i32
  }
  func.func @transform_4(%arg0: i32) -> (i32, i32) {
    %c0_i32 = arith.constant 0 : i32
    %c0_i32_0 = arith.constant 0 : i32
    return %arg0, %c0_i32 : i32, i32
  }
}

module attributes {stable_mosaic.version = 11 : i64} {
  func.func @_heads_kernel(%arg0: memref<128x64xbf16, #tpu.memory_space<vmem>>, %arg1: memref<64x32xf32, #tpu.memory_space<vmem>>, %arg2: memref<1x32xf32, #tpu.memory_space<vmem>>, %arg3: memref<1x32xf32, #tpu.memory_space<vmem>>, %arg4: memref<1x1xf32, #tpu.memory_space<vmem>>, %arg5: memref<64x32xf32, #tpu.memory_space<vmem>>, %arg6: memref<1x32xf32, #tpu.memory_space<vmem>>, %arg7: memref<1x32xf32, #tpu.memory_space<vmem>>, %arg8: memref<1x1xf32, #tpu.memory_space<vmem>>, %arg9: memref<128x1xf32, #tpu.memory_space<vmem>>) attributes {dimension_semantics = [], scalar_prefetch = 0 : i64, scratch_operands = 0 : i64, tpu.core_type = #tpu.core_type<tc>} {
    %c0 = arith.constant 0 : index
    %c0_0 = arith.constant 0 : index
    %0 = vector.load %arg0[%c0, %c0_0] : memref<128x64xbf16, #tpu.memory_space<vmem>>, vector<8x64xbf16>
    %1 = arith.extf %0 : vector<8x64xbf16> to vector<8x64xf32>
    %c8 = arith.constant 8 : index
    %c0_1 = arith.constant 0 : index
    %2 = vector.load %arg0[%c8, %c0_1] : memref<128x64xbf16, #tpu.memory_space<vmem>>, vector<8x64xbf16>
    %3 = arith.extf %2 : vector<8x64xbf16> to vector<8x64xf32>
    %cst = arith.constant 0.000000e+00 : f32
    %4 = vector.broadcast %cst : f32 to vector<128x1xf32>
    %c0_2 = arith.constant 0 : index
    %c0_3 = arith.constant 0 : index
    %5 = vector.load %arg9[%c0_2, %c0_3] : memref<128x1xf32, #tpu.memory_space<vmem>>, vector<128x1xf32>
    tpu.vector_store %arg9[%c0_2, %c0_3], %4 {strides = array<i32>} : memref<128x1xf32, #tpu.memory_space<vmem>>, vector<128x1xf32>,
    %c0_4 = arith.constant 0 : index
    %c0_5 = arith.constant 0 : index
    %6 = vector.load %arg1[%c0_4, %c0_5] : memref<64x32xf32, #tpu.memory_space<vmem>>, vector<64x32xf32>
    %c0_6 = arith.constant 0 : index
    %c0_7 = arith.constant 0 : index
    %7 = vector.load %arg2[%c0_6, %c0_7] : memref<1x32xf32, #tpu.memory_space<vmem>>, vector<1x32xf32>
    %c0_8 = arith.constant 0 : index
    %c0_9 = arith.constant 0 : index
    %8 = vector.load %arg3[%c0_8, %c0_9] : memref<1x32xf32, #tpu.memory_space<vmem>>, vector<1x32xf32>
    %c0_10 = arith.constant 0 : index
    %c0_11 = arith.constant 0 : index
    %9 = vector.load %arg4[%c0_10, %c0_11] : memref<1x1xf32, #tpu.memory_space<vmem>>, vector<1x1xf32>
    %cst_12 = arith.constant dense<0.000000e+00> : vector<8x32xf32>
    %10 = tpu.matmul %1, %6, %cst_12 {dimension_numbers = #tpu.dot_dimension_numbers<[1], [0], [0], [1], [0, 0, 1, 1], [], []>} : vector<8x64xf32>, vector<64x32xf32>, vector<8x32xf32> -> vector<8x32xf32>
    %11 = vector.broadcast %7 : vector<1x32xf32> to vector<8x32xf32>
    %12 = arith.addf %10, %11 : vector<8x32xf32>
    %cst_13 = arith.constant 0.000000e+00 : f32
    %13 = vector.broadcast %cst_13 : f32 to vector<8x32xf32>
    %14 = arith.maximumf %12, %13 : vector<8x32xf32>
    %15 = vector.broadcast %8 : vector<1x32xf32> to vector<8x32xf32>
    %16 = arith.mulf %14, %15 : vector<8x32xf32>
    %cst_14 = arith.constant dense<0.000000e+00> : vector<8xf32>
    %17 = vector.multi_reduction <add>, %16, %cst_14 [1] : vector<8x32xf32> to vector<8xf32>
    %18 = vector.shape_cast %17 : vector<8xf32> to vector<8x1xf32>
    %19 = vector.broadcast %9 : vector<1x1xf32> to vector<8x1xf32>
    %20 = arith.addf %18, %19 : vector<8x1xf32>
    %21 = math.absf %20 : vector<8x1xf32>
    %cst_15 = arith.constant 0.000000e+00 : f32
    %22 = vector.broadcast %cst_15 : f32 to vector<8x1xf32>
    %23 = arith.subf %22, %21 : vector<8x1xf32>
    %24 = math.exp %23 : vector<8x1xf32>
    %cst_16 = arith.constant 0.000000e+00 : f32
    %25 = vector.broadcast %cst_16 : f32 to vector<8x1xf32>
    %26 = arith.cmpf oge, %20, %25 : vector<8x1xf32>
    %cst_17 = arith.constant 1.000000e+00 : f32
    %27 = vector.broadcast %cst_17 : f32 to vector<8x1xf32>
    %28 = arith.addf %27, %24 : vector<8x1xf32>
    %cst_18 = arith.constant 1.000000e+00 : f32
    %29 = vector.broadcast %cst_18 : f32 to vector<8x1xf32>
    %30 = arith.divf %29, %28 : vector<8x1xf32>
    %cst_19 = arith.constant 1.000000e+00 : f32
    %31 = vector.broadcast %cst_19 : f32 to vector<8x1xf32>
    %32 = arith.addf %31, %24 : vector<8x1xf32>
    %33 = arith.divf %24, %32 : vector<8x1xf32>
    %34 = arith.select %26, %30, %33 : vector<8x1xi1>, vector<8x1xf32>
    %c0_20 = arith.constant 0 : index
    %c0_21 = arith.constant 0 : index
    %35 = vector.load %arg9[%c0_20, %c0_21] : memref<128x1xf32, #tpu.memory_space<vmem>>, vector<8x1xf32>
    tpu.vector_store %arg9[%c0_20, %c0_21], %34 {strides = array<i32>} : memref<128x1xf32, #tpu.memory_space<vmem>>, vector<8x1xf32>,
    %c0_22 = arith.constant 0 : index
    %c0_23 = arith.constant 0 : index
    %36 = vector.load %arg5[%c0_22, %c0_23] : memref<64x32xf32, #tpu.memory_space<vmem>>, vector<64x32xf32>
    %c0_24 = arith.constant 0 : index
    %c0_25 = arith.constant 0 : index
    %37 = vector.load %arg6[%c0_24, %c0_25] : memref<1x32xf32, #tpu.memory_space<vmem>>, vector<1x32xf32>
    %c0_26 = arith.constant 0 : index
    %c0_27 = arith.constant 0 : index
    %38 = vector.load %arg7[%c0_26, %c0_27] : memref<1x32xf32, #tpu.memory_space<vmem>>, vector<1x32xf32>
    %c0_28 = arith.constant 0 : index
    %c0_29 = arith.constant 0 : index
    %39 = vector.load %arg8[%c0_28, %c0_29] : memref<1x1xf32, #tpu.memory_space<vmem>>, vector<1x1xf32>
    %cst_30 = arith.constant dense<0.000000e+00> : vector<8x32xf32>
    %40 = tpu.matmul %3, %36, %cst_30 {dimension_numbers = #tpu.dot_dimension_numbers<[1], [0], [0], [1], [0, 0, 1, 1], [], []>} : vector<8x64xf32>, vector<64x32xf32>, vector<8x32xf32> -> vector<8x32xf32>
    %41 = vector.broadcast %37 : vector<1x32xf32> to vector<8x32xf32>
    %42 = arith.addf %40, %41 : vector<8x32xf32>
    %cst_31 = arith.constant 0.000000e+00 : f32
    %43 = vector.broadcast %cst_31 : f32 to vector<8x32xf32>
    %44 = arith.maximumf %42, %43 : vector<8x32xf32>
    %45 = vector.broadcast %38 : vector<1x32xf32> to vector<8x32xf32>
    %46 = arith.mulf %44, %45 : vector<8x32xf32>
    %cst_32 = arith.constant dense<0.000000e+00> : vector<8xf32>
    %47 = vector.multi_reduction <add>, %46, %cst_32 [1] : vector<8x32xf32> to vector<8xf32>
    %48 = vector.shape_cast %47 : vector<8xf32> to vector<8x1xf32>
    %49 = vector.broadcast %39 : vector<1x1xf32> to vector<8x1xf32>
    %50 = arith.addf %48, %49 : vector<8x1xf32>
    %51 = math.absf %50 : vector<8x1xf32>
    %cst_33 = arith.constant 0.000000e+00 : f32
    %52 = vector.broadcast %cst_33 : f32 to vector<8x1xf32>
    %53 = arith.subf %52, %51 : vector<8x1xf32>
    %54 = math.exp %53 : vector<8x1xf32>
    %cst_34 = arith.constant 0.000000e+00 : f32
    %55 = vector.broadcast %cst_34 : f32 to vector<8x1xf32>
    %56 = arith.cmpf oge, %50, %55 : vector<8x1xf32>
    %cst_35 = arith.constant 1.000000e+00 : f32
    %57 = vector.broadcast %cst_35 : f32 to vector<8x1xf32>
    %58 = arith.addf %57, %54 : vector<8x1xf32>
    %cst_36 = arith.constant 1.000000e+00 : f32
    %59 = vector.broadcast %cst_36 : f32 to vector<8x1xf32>
    %60 = arith.divf %59, %58 : vector<8x1xf32>
    %cst_37 = arith.constant 1.000000e+00 : f32
    %61 = vector.broadcast %cst_37 : f32 to vector<8x1xf32>
    %62 = arith.addf %61, %54 : vector<8x1xf32>
    %63 = arith.divf %54, %62 : vector<8x1xf32>
    %64 = arith.select %56, %60, %63 : vector<8x1xi1>, vector<8x1xf32>
    %c8_38 = arith.constant 8 : index
    %c0_39 = arith.constant 0 : index
    %65 = vector.load %arg9[%c8_38, %c0_39] : memref<128x1xf32, #tpu.memory_space<vmem>>, vector<8x1xf32>
    tpu.vector_store %arg9[%c8_38, %c0_39], %64 {strides = array<i32>} : memref<128x1xf32, #tpu.memory_space<vmem>>, vector<8x1xf32>,
    return
  }
}

</mosaic_0001>

<bundles_post_ra>
// kernel: graph_model_forward.5
= control target key start
LH: loop header
LB: loop body
LE: loop exit
PB: predicated region body
PF: predicated region fallthrough
CT: control target
= control target key end

     0   :  { %vm37_vm0 = vcmask 1042432   ;;  %vm125_vm1 = vcmask 1044480   ;;  %v248_v0 = vmov 0.0   ;;  %vm33_vm2 = vcmask 23552   ;;  %s376_s2 = inlined_call_operand.vmem [shape: f32[3,32], index: 2, kind: input, shape index: {}]   ;;  %s377_s4 = inlined_call_operand.vmem [shape: f32[5,32], index: 4, kind: input, shape index: {}]   ;;  %s378_s0 = inlined_call_operand.vmem [shape: f32[8,3], index: 0, kind: input, shape index: {}]   ;;  %s379_s1 = inlined_call_operand.vmem [shape: f32[8,5], index: 1, kind: input, shape index: {}]   ;;  %s380_s6 = inlined_call_operand.vmem [shape: bf16[128,32], index: 6, kind: output, shape index: {}]   ;;  %s381_s3 = inlined_call_operand.vmem [shape: f32[1,32], index: 3, kind: input, shape index: {}]   ;;  %s382_s5 = inlined_call_operand.vmem [shape: f32[1,32], index: 5, kind: input, shape index: {}]  }
   0x1   :  { %235 = vmatprep.subr.mxu0 %v248_v0  ;;  %240 = vmatprep.subr.mxu1 %v248_v0  ;;  %v25_v1 = vld [vmem:[%s376_s2] sm:$0x7]  ;;  %vm249_vm3 = vmmov 0   ;;  %vm121_vm4 = vcmask 39936   ;;  %vm200_vm5 = vcmask 257024   ;;  %v250_v5 = vmov 0  }
   0x2   :  { %v113_v2 = vld [vmem:[%s377_s4] sm:$0x1f]  ;;  %236 = vmatpush3.msk.msra.mxu0 %vm37_vm0, %v25_v1  ;;  %237 = vmatprep.mubr.msk.f32.mxu0 %vm249_vm3, %v248_v0  ;;  %201 = vst.msk [vmem:[%s380_s6] sm:$0xf] %vm200_vm5, %v250_v5  ;;  %203 = vst.msk [vmem:[%s380_s6 + $0x8] sm:$0xf] %vm200_vm5, %v250_v5 }
   0x3   :  { %v24_v3 = vld [vmem:[%s378_s0] sm:$0xff]  ;;  %241 = vmatpush3.msk.msra.mxu1 %vm125_vm1, %v113_v2  ;;  %242 = vmatprep.mubr.msk.f32.mxu1 %vm249_vm3, %v248_v0  ;;  %204 = vst.msk [vmem:[%s380_s6 + $0xc] sm:$0xf] %vm200_vm5, %v250_v5  ;;  %205 = vst.msk [vmem:[%s380_s6 + $0x10] sm:$0xf] %vm200_vm5, %v250_v5 }
   0x4   :  { %v112_v4 = vld [vmem:[%s379_s1] sm:$0xff]  ;;  %238 = vmatmul.mubr.msk.f32.vlgmr.msra.gmra.mxu0 %vm33_vm2, %v24_v3  ;;  %206 = vst.msk [vmem:[%s380_s6 + $0x14] sm:$0xf] %vm200_vm5, %v250_v5  ;;  %207 = vst.msk [vmem:[%s380_s6 + $0x18] sm:$0xf] %vm200_vm5, %v250_v5 }
   0x5   :  { %243 = vmatmul.mubr.msk.f32.vlgmr.msra.gmra.mxu1 %vm121_vm4, %v112_v4  ;;  %208 = vst.msk [vmem:[%s380_s6 + $0x1c] sm:$0xf] %vm200_vm5, %v250_v5  ;;  %209 = vst.msk [vmem:[%s380_s6 + $0x20] sm:$0xf] %vm200_vm5, %v250_v5  ;;  %v225_v6 = vld [vmem:[%s381_s3] ss:$0 sm:$0xff] }
   0x6   :  { %210 = vst.msk [vmem:[%s380_s6 + $0x24] sm:$0xf] %vm200_vm5, %v250_v5  ;;  %211 = vst.msk [vmem:[%s380_s6 + $0x28] sm:$0xf] %vm200_vm5, %v250_v5  ;;  %v228_v7 = vld [vmem:[%s382_s5] ss:$0 sm:$0xff] }
   0x7   :  { %212 = vst.msk [vmem:[%s380_s6 + $0x2c] sm:$0xf] %vm200_vm5, %v250_v5  ;;  %213 = vst.msk [vmem:[%s380_s6 + $0x30] sm:$0xf] %vm200_vm5, %v250_v5 }
   0x8   :  { %214 = vst.msk [vmem:[%s380_s6 + $0x34] sm:$0xf] %vm200_vm5, %v250_v5  ;;  %215 = vst.msk [vmem:[%s380_s6 + $0x38] sm:$0xf] %vm200_vm5, %v250_v5 }
   0x9   :  { %216 = vst.msk [vmem:[%s380_s6 + $0x3c] sm:$0xf] %vm200_vm5, %v250_v5  ;;  %202 = vst.msk [vmem:[%s380_s6 + $0x4] sm:$0xf] %vm200_vm5, %v250_v5 }
  0xc4   :  { %v107_v8 = vpop.f32.mrf.mxu0 }
  0xc5   :  { %v195_v9 = vpop.f32.mrf.mxu1  ;;  %v108_v10 = vadd.f32 %v225_v6, %v107_v8 }
  0xc6   :  { %v196_v11 = vadd.f32 %v228_v7, %v195_v9  ;;  %v239_v12 = vpop.f32.mrf.mxu0 }
  0xc7   :  { %v244_v13 = vpop.f32.mrf.mxu1  ;;  %v111_v14 = vmax.f32 %v108_v10, 0.0 }
  0xc8   :  { %v199_v15 = vmax.f32 %v196_v11, 0.0 }
  0xc9   :  { %v217_v16 = vpack.c.bf16 %v111_v14, %v111_v14 }
  0xca   :  { %v219_v17 = vpack.c.bf16 %v199_v15, %v199_v15 }
  0xcb   :  { %218 = vst.msk [vmem:[%s380_s6] sm:$0xf] %vm200_vm5, %v217_v16 }
  0xcc   :  { %220 = vst.msk [vmem:[%s380_s6 + $0x4] sm:$0xf] %vm200_vm5, %v219_v17 }

// kernel: graph_model_forward.6
= control target key start
LH: loop header
LB: loop body
LE: loop exit
PB: predicated region body
PF: predicated region fallthrough
CT: control target
= control target key end

     0   :  { %vm274_vm0 = vcmask 261120   ;;  %vm460_vm1 = vcmask 519168   ;;  %s808_s1 = inlined_call_operand.vmem [shape: bf16[128,32], index: 1, kind: input, shape index: {}]   ;;  %s809_s0 = inlined_call_operand.vmem [shape: bf16[128,128], index: 0, kind: input, shape index: {}]   ;;  %s810_s2 = inlined_call_operand.vmem [shape: bf16[32,64], index: 2, kind: input, shape index: {}]   ;;  %s811_s3 = inlined_call_operand.vmem [shape: f32[1,64], index: 3, kind: input, shape index: {}]   ;;  %s812_s4 = inlined_call_operand.vmem [shape: bf16[128,64], index: 4, kind: output, shape index: {}]  }
   0x1   :  { %v618_v0 = vld [vmem:[%s808_s1 + $0x38] sm:$0xff]   ;;  %v619_v1 = vld [vmem:[%s808_s1 + $0x30] sm:$0xff]   ;;  %v620_v2 = vld [vmem:[%s808_s1 + $0x28] sm:$0xff]  }
   0x2   :  { %566 = vmatprep.subr.bf16.mxu0 %v618_v0  ;;  %v621_v3 = vld [vmem:[%s808_s1 + $0x20] sm:$0xff]   ;;  %v622_v5 = vld [vmem:[%s808_s1 + $0x18] sm:$0xff]   ;;  %v623_v6 = vld [vmem:[%s808_s1 + $0x10] sm:$0xff]  }
   0x3   :  { %567 = vmatpush3.bf16.msra.mxu0 %v618_v0  ;;  %v626_v4 = vld [vmem:[%s809_s0] sm:$0xff]   ;;  %v624_v7 = vld [vmem:[%s808_s1 + $0x8] sm:$0xff]   ;;  %v628_v10 = vld [vmem:[%s809_s0 + $0x10] sm:$0xff]  }
   0x4   :  { %568 = vmatprep.subr.bf16.mxu0 %v619_v1  ;;  %582 = vmatprep.mubr.bf16.mxu0 %v626_v4  ;;  %v625_v8 = vld [vmem:[%s808_s1] sm:$0xff]   ;;  %v627_v9 = vld [vmem:[%s809_s0 + $0x8] sm:$0xff]   ;;  %v629_v11 = vld [vmem:[%s809_s0 + $0x18] sm:$0xff]  }
   0x5   :  { %v630_v12 = vld [vmem:[%s809_s0 + $0x20] sm:$0xff]   ;;  %v631_v13 = vld [vmem:[%s809_s0 + $0x28] sm:$0xff]   ;;  %v632_v14 = vld [vmem:[%s809_s0 + $0x30] sm:$0xff]  }
   0x6   :  { %v633_v15 = vld [vmem:[%s809_s0 + $0x38] sm:$0xff]   ;;  %v634_v16 = vld [vmem:[%s810_s2 + $0x8] sm:$0xff]   ;;  %v635_v17 = vld [vmem:[%s810_s2] sm:$0xff]  }
   0x7   :  { %569 = vmatpush3.bf16.msra.mxu0 %v619_v1  ;;  %598 = vmatprep.subr.bf16.mxu1 %v634_v16  ;;  %v726_v42 = vld [vmem:[%s811_s3] ss:$0 sm:$0xff] }
   0x8   :  { %570 = vmatprep.subr.bf16.mxu0 %v620_v2  ;;  %599 = vmatpush3.bf16.msra.mxu1 %v634_v16 }
   0x9   :  { %600 = vmatprep.subr.bf16.mxu1 %v635_v17 }
   0xb   :  { %571 = vmatpush3.bf16.msra.mxu0 %v620_v2 }
   0xc   :  { %572 = vmatprep.subr.bf16.mxu0 %v621_v3  ;;  %601 = vmatpush3.bf16.msra.mxu1 %v635_v17 }
   0xf   :  { %573 = vmatpush3.bf16.msra.mxu0 %v621_v3 }
  0x10   :  { %574 = vmatprep.subr.bf16.mxu0 %v622_v5 }
  0x13   :  { %575 = vmatpush3.bf16.msra.mxu0 %v622_v5 }
  0x14   :  { %576 = vmatprep.subr.bf16.mxu0 %v623_v6 }
  0x17   :  { %577 = vmatpush3.bf16.msra.mxu0 %v623_v6 }
  0x18   :  { %578 = vmatprep.subr.bf16.mxu0 %v624_v7 }
  0x1b   :  { %579 = vmatpush3.bf16.msra.mxu0 %v624_v7 }
  0x1c   :  { %580 = vmatprep.subr.bf16.mxu0 %v625_v8 }
  0x1f   :  { %581 = vmatpush3.bf16.msra.mxu0 %v625_v8 }
  0x22   :  { %583 = vmatmul.mubr.bf16.vlgmr.msra.gmra.mxu0 %v627_v9 }
  0x23   :  { %586 = vmatprep.mubr.bf16.mxu0 %v628_v10 }
  0x2a   :  { %587 = vmatmul.mubr.bf16.gmra.mxu0 %v629_v11 }
  0x2b   :  { %590 = vmatprep.mubr.bf16.mxu0 %v630_v12 }
  0x32   :  { %591 = vmatmul.mubr.bf16.gmra.mxu0 %v631_v13 }
  0x33   :  { %594 = vmatprep.mubr.bf16.mxu0 %v632_v14 }
  0x3a   :  { %595 = vmatmul.mubr.bf16.gmra.mxu0 %v633_v15 }
  0xe2   :  { %v584_v18 = vpop.f32.mrf.mxu0 }
  0xe4   :  { %v180_v19 = vpop.f32.mrf.mxu0 }
  0xe6   :  { %v585_v20 = vpop.f32.mrf.mxu0 }
  0xe7   :  { %v244_v23 = vpack.c.bf16 %v585_v20, %v584_v18 }
  0xe8   :  { %v183_v21 = vpop.f32.mrf.mxu0 }
  0xe9   :  { %v243_v22 = vpack.c.bf16 %v183_v21, %v180_v19 }
  0xea   :  { %v588_v24 = vpop.f32.mrf.mxu0 }
  0xeb   :  { %602 = vmatprep.mubr.msk.bf16.mxu1 %vm274_vm0, %v243_v22 }
  0xec   :  { %v196_v25 = vpop.f32.mrf.mxu0  ;;  %603 = vmatmul.mubr.msk.bf16.vlgmr.msra.gmra.mxu1 %vm274_vm0, %v244_v23 }
  0xee   :  { %v589_v26 = vpop.f32.mrf.mxu0 }
  0xef   :  { %v246_v29 = vpack.c.bf16 %v589_v26, %v588_v24 }
  0xf0   :  { %v199_v27 = vpop.f32.mrf.mxu0 }
  0xf1   :  { %v245_v28 = vpack.c.bf16 %v199_v27, %v196_v25 }
  0xf2   :  { %v592_v30 = vpop.f32.mrf.mxu0 }
  0xf3   :  { %606 = vmatprep.mubr.msk.bf16.mxu1 %vm274_vm0, %v245_v28 }
  0xf4   :  { %v212_v31 = vpop.f32.mrf.mxu0  ;;  %607 = vmatmul.mubr.msk.bf16.gmra.mxu1 %vm274_vm0, %v246_v29 }
  0xf6   :  { %v593_v32 = vpop.f32.mrf.mxu0 }
  0xf7   :  { %v248_v35 = vpack.c.bf16 %v593_v32, %v592_v30 }
  0xf8   :  { %v215_v33 = vpop.f32.mrf.mxu0 }
  0xf9   :  { %v247_v34 = vpack.c.bf16 %v215_v33, %v212_v31 }
  0xfa   :  { %v596_v36 = vpop.f32.mrf.mxu0 }
  0xfb   :  { %610 = vmatprep.mubr.msk.bf16.mxu1 %vm274_vm0, %v247_v34 }
  0xfc   :  { %v228_v37 = vpop.f32.mrf.mxu0  ;;  %611 = vmatmul.mubr.msk.bf16.gmra.mxu1 %vm274_vm0, %v248_v35 }
  0xfe   :  { %v597_v38 = vpop.f32.mrf.mxu0 }
  0xff   :  { %v250_v41 = vpack.c.bf16 %v597_v38, %v596_v36 }
 0x100   :  { %v231_v39 = vpop.f32.mrf.mxu0 }
 0x101   :  { %v249_v40 = vpack.c.bf16 %v231_v39, %v228_v37 }
 0x103   :  { %614 = vmatprep.mubr.msk.bf16.mxu1 %vm274_vm0, %v249_v40 }
 0x104   :  { %615 = vmatmul.mubr.msk.bf16.gmra.mxu1 %vm274_vm0, %v250_v41 }
 0x1ac   :  { %v604_v43 = vpop.f32.mrf.mxu1 }
 0x1ad   :  { %v342_v44 = vadd.f32 %v604_v43, %v726_v42 }
 0x1ae   :  { %v333_v45 = vpop.f32.mrf.mxu1 }
 0x1af   :  { %v526_v46 = vpack.c.bf16 %v342_v44, %v342_v44  ;;  %v334_v47 = vadd.f32 %v726_v42, %v333_v45 }
 0x1b0   :  { %v605_v48 = vpop.f32.mrf.mxu1 }
 0x1b1   :  { %463 = vst.msk [vmem:[%s812_s4 + $0x8] sm:$0xf] %vm460_vm1, %v526_v46  ;;  %v524_v49 = vpack.c.bf16 %v334_v47, %v334_v47  ;;  %v345_v50 = vadd.f32 %v605_v48, %v726_v42 }
 0x1b2   :  { %v336_v51 = vpop.f32.mrf.mxu1 }
 0x1b3   :  { %461 = vst.msk [vmem:[%s812_s4] sm:$0xf] %vm460_vm1, %v524_v49  ;;  %v527_v52 = vpack.c.bf16 %v345_v50, %v345_v50  ;;  %v337_v53 = vadd.f32 %v726_v42, %v336_v51 }
 0x1b4   :  { %v608_v54 = vpop.f32.mrf.mxu1 }
 0x1b5   :  { %464 = vst.msk [vmem:[%s812_s4 + $0xc] sm:$0xf] %vm460_vm1, %v527_v52  ;;  %v525_v55 = vpack.c.bf16 %v337_v53, %v337_v53  ;;  %v358_v56 = vadd.f32 %v608_v54, %v726_v42 }
 0x1b6   :  { %v349_v57 = vpop.f32.mrf.mxu1 }
 0x1b7   :  { %462 = vst.msk [vmem:[%s812_s4 + $0x4] sm:$0xf] %vm460_vm1, %v525_v55  ;;  %v530_v58 = vpack.c.bf16 %v358_v56, %v358_v56  ;;  %v350_v59 = vadd.f32 %v726_v42, %v349_v57 }
 0x1b8   :  { %v609_v60 = vpop.f32.mrf.mxu1 }
 0x1b9   :  { %467 = vst.msk [vmem:[%s812_s4 + $0x18] sm:$0xf] %vm460_vm1, %v530_v58  ;;  %v528_v61 = vpack.c.bf16 %v350_v59, %v350_v59  ;;  %v361_v62 = vadd.f32 %v609_v60, %v726_v42 }
 0x1ba   :  { %v352_v63 = vpop.f32.mrf.mxu1 }
 0x1bb   :  { %465 = vst.msk [vmem:[%s812_s4 + $0x10] sm:$0xf] %vm460_vm1, %v528_v61  ;;  %v531_v0 = vpack.c.bf16 %v361_v62, %v361_v62  ;;  %v353_v1 = vadd.f32 %v726_v42, %v352_v63 }
 0x1bc   :  { %v612_v2 = vpop.f32.mrf.mxu1 }
 0x1bd   :  { %468 = vst.msk [vmem:[%s812_s4 + $0x1c] sm:$0xf] %vm460_vm1, %v531_v0  ;;  %v529_v3 = vpack.c.bf16 %v353_v1, %v353_v1  ;;  %v374_v4 = vadd.f32 %v612_v2, %v726_v42 }
 0x1be   :  { %v365_v5 = vpop.f32.mrf.mxu1 }
 0x1bf   :  { %466 = vst.msk [vmem:[%s812_s4 + $0x14] sm:$0xf] %vm460_vm1, %v529_v3  ;;  %v534_v6 = vpack.c.bf16 %v374_v4, %v374_v4  ;;  %v366_v7 = vadd.f32 %v726_v42, %v365_v5 }
 0x1c0   :  { %v613_v8 = vpop.f32.mrf.mxu1 }
 0x1c1   :  { %471 = vst.msk [vmem:[%s812_s4 + $0x28] sm:$0xf] %vm460_vm1, %v534_v6  ;;  %v532_v9 = vpack.c.bf16 %v366_v7, %v366_v7  ;;  %v377_v10 = vadd.f32 %v613_v8, %v726_v42 }
 0x1c2   :  { %v368_v11 = vpop.f32.mrf.mxu1 }
 0x1c3   :  { %469 = vst.msk [vmem:[%s812_s4 + $0x20] sm:$0xf] %vm460_vm1, %v532_v9  ;;  %v535_v12 = vpack.c.bf16 %v377_v10, %v377_v10  ;;  %v369_v13 = vadd.f32 %v726_v42, %v368_v11 }
 0x1c4   :  { %v616_v14 = vpop.f32.mrf.mxu1 }
 0x1c5   :  { %472 = vst.msk [vmem:[%s812_s4 + $0x2c] sm:$0xf] %vm460_vm1, %v535_v12  ;;  %v533_v15 = vpack.c.bf16 %v369_v13, %v369_v13  ;;  %v390_v16 = vadd.f32 %v616_v14, %v726_v42 }
 0x1c6   :  { %v381_v17 = vpop.f32.mrf.mxu1 }
 0x1c7   :  { %470 = vst.msk [vmem:[%s812_s4 + $0x24] sm:$0xf] %vm460_vm1, %v533_v15  ;;  %v538_v18 = vpack.c.bf16 %v390_v16, %v390_v16  ;;  %v382_v19 = vadd.f32 %v726_v42, %v381_v17 }
 0x1c8   :  { %v617_v20 = vpop.f32.mrf.mxu1 }
 0x1c9   :  { %475 = vst.msk [vmem:[%s812_s4 + $0x38] sm:$0xf] %vm460_vm1, %v538_v18  ;;  %v536_v21 = vpack.c.bf16 %v382_v19, %v382_v19  ;;  %v393_v22 = vadd.f32 %v617_v20, %v726_v42 }
 0x1ca   :  { %v384_v23 = vpop.f32.mrf.mxu1 }
 0x1cb   :  { %473 = vst.msk [vmem:[%s812_s4 + $0x30] sm:$0xf] %vm460_vm1, %v536_v21  ;;  %v539_v24 = vpack.c.bf16 %v393_v22, %v393_v22  ;;  %v385_v25 = vadd.f32 %v726_v42, %v384_v23 }
 0x1cd   :  { %476 = vst.msk [vmem:[%s812_s4 + $0x3c] sm:$0xf] %vm460_vm1, %v539_v24  ;;  %v537_v26 = vpack.c.bf16 %v385_v25, %v385_v25 }
 0x1cf   :  { %474 = vst.msk [vmem:[%s812_s4 + $0x34] sm:$0xf] %vm460_vm1, %v537_v26 }

// kernel: graph_model_forward.7
= control target key start
LH: loop header
LB: loop body
LE: loop exit
PB: predicated region body
PF: predicated region fallthrough
CT: control target
= control target key end

     0   :  { %vm290_vm0 = vcmask 523264   ;;  %vm476_vm1 = vcmask 519168   ;;  %s840_s1 = inlined_call_operand.vmem [shape: bf16[128,64], index: 1, kind: input, shape index: {}]   ;;  %s841_s0 = inlined_call_operand.vmem [shape: bf16[128,128], index: 0, kind: input, shape index: {}]   ;;  %s842_s2 = inlined_call_operand.vmem [shape: bf16[64,64], index: 2, kind: input, shape index: {}]   ;;  %s843_s3 = inlined_call_operand.vmem [shape: f32[1,64], index: 3, kind: input, shape index: {}]   ;;  %s844_s4 = inlined_call_operand.vmem [shape: bf16[128,64], index: 4, kind: output, shape index: {}]  }
   0x1   :  { %v642_v0 = vld [vmem:[%s840_s1 + $0x38] sm:$0xff]   ;;  %v643_v1 = vld [vmem:[%s840_s1 + $0x30] sm:$0xff]   ;;  %v644_v2 = vld [vmem:[%s840_s1 + $0x28] sm:$0xff]  }
   0x2   :  { %586 = vmatprep.subr.bf16.mxu0 %v642_v0  ;;  %v645_v3 = vld [vmem:[%s840_s1 + $0x20] sm:$0xff]   ;;  %v646_v5 = vld [vmem:[%s840_s1 + $0x18] sm:$0xff]   ;;  %v647_v6 = vld [vmem:[%s840_s1 + $0x10] sm:$0xff]  }
   0x3   :  { %587 = vmatpush3.bf16.msra.mxu0 %v642_v0  ;;  %v650_v4 = vld [vmem:[%s841_s0] sm:$0xff]   ;;  %v658_v7 = vld [vmem:[%s842_s2 + $0x18] sm:$0xff]   ;;  %v659_v8 = vld [vmem:[%s842_s2 + $0x10] sm:$0xff]  }
   0x4   :  { %588 = vmatprep.subr.bf16.mxu0 %v643_v1  ;;  %602 = vmatprep.mubr.bf16.mxu0 %v650_v4  ;;  %v648_v9 = vld [vmem:[%s840_s1 + $0x8] sm:$0xff]   ;;  %v649_v10 = vld [vmem:[%s840_s1] sm:$0xff]   ;;  %v652_v12 = vld [vmem:[%s841_s0 + $0x10] sm:$0xff]  }
   0x5   :  { %618 = vmatprep.subr.bf16.mxu1 %v658_v7  ;;  %v651_v11 = vld [vmem:[%s841_s0 + $0x8] sm:$0xff]   ;;  %v653_v13 = vld [vmem:[%s841_s0 + $0x18] sm:$0xff]   ;;  %v654_v14 = vld [vmem:[%s841_s0 + $0x20] sm:$0xff]  }
   0x6   :  { %619 = vmatpush3.bf16.msra.mxu1 %v658_v7  ;;  %v655_v15 = vld [vmem:[%s841_s0 + $0x28] sm:$0xff]   ;;  %v656_v16 = vld [vmem:[%s841_s0 + $0x30] sm:$0xff]   ;;  %v657_v17 = vld [vmem:[%s841_s0 + $0x38] sm:$0xff]  }
   0x7   :  { %589 = vmatpush3.bf16.msra.mxu0 %v643_v1  ;;  %620 = vmatprep.subr.bf16.mxu1 %v659_v8  ;;  %v660_v18 = vld [vmem:[%s842_s2 + $0x8] sm:$0xff]   ;;  %v661_v19 = vld [vmem:[%s842_s2] sm:$0xff]  }
   0x8   :  { %590 = vmatprep.subr.bf16.mxu0 %v644_v2  ;;  %v758_v44 = vld [vmem:[%s843_s3] ss:$0 sm:$0xff] }
   0xa   :  { %621 = vmatpush3.bf16.msra.mxu1 %v659_v8 }
   0xb   :  { %591 = vmatpush3.bf16.msra.mxu0 %v644_v2  ;;  %622 = vmatprep.subr.bf16.mxu1 %v660_v18 }
   0xc   :  { %592 = vmatprep.subr.bf16.mxu0 %v645_v3 }
   0xe   :  { %623 = vmatpush3.bf16.msra.mxu1 %v660_v18 }
   0xf   :  { %593 = vmatpush3.bf16.msra.mxu0 %v645_v3  ;;  %624 = vmatprep.subr.bf16.mxu1 %v661_v19 }
  0x10   :  { %594 = vmatprep.subr.bf16.mxu0 %v646_v5 }
  0x12   :  { %625 = vmatpush3.bf16.msra.mxu1 %v661_v19 }
  0x13   :  { %595 = vmatpush3.bf16.msra.mxu0 %v646_v5 }
  0x14   :  { %596 = vmatprep.subr.bf16.mxu0 %v647_v6 }
  0x17   :  { %597 = vmatpush3.bf16.msra.mxu0 %v647_v6 }
  0x18   :  { %598 = vmatprep.subr.bf16.mxu0 %v648_v9 }
  0x1b   :  { %599 = vmatpush3.bf16.msra.mxu0 %v648_v9 }
  0x1c   :  { %600 = vmatprep.subr.bf16.mxu0 %v649_v10 }
  0x1f   :  { %601 = vmatpush3.bf16.msra.mxu0 %v649_v10 }
  0x22   :  { %603 = vmatmul.mubr.bf16.vlgmr.msra.gmra.mxu0 %v651_v11 }
  0x23   :  { %606 = vmatprep.mubr.bf16.mxu0 %v652_v12 }
  0x2a   :  { %607 = vmatmul.mubr.bf16.gmra.mxu0 %v653_v13 }
  0x2b   :  { %610 = vmatprep.mubr.bf16.mxu0 %v654_v14 }
  0x32   :  { %611 = vmatmul.mubr.bf16.gmra.mxu0 %v655_v15 }
  0x33   :  { %614 = vmatprep.mubr.bf16.mxu0 %v656_v16 }
  0x3a   :  { %615 = vmatmul.mubr.bf16.gmra.mxu0 %v657_v17 }
  0xe2   :  { %v604_v20 = vpop.f32.mrf.mxu0 }
  0xe4   :  { %v180_v21 = vpop.f32.mrf.mxu0 }
  0xe6   :  { %v605_v22 = vpop.f32.mrf.mxu0 }
  0xe7   :  { %v244_v25 = vpack.c.bf16 %v605_v22, %v604_v20 }
  0xe8   :  { %v183_v23 = vpop.f32.mrf.mxu0 }
  0xe9   :  { %v243_v24 = vpack.c.bf16 %v183_v23, %v180_v21 }
  0xea   :  { %v608_v26 = vpop.f32.mrf.mxu0 }
  0xeb   :  { %626 = vmatprep.mubr.msk.bf16.mxu1 %vm290_vm0, %v243_v24 }
  0xec   :  { %v196_v27 = vpop.f32.mrf.mxu0  ;;  %627 = vmatmul.mubr.msk.bf16.vlgmr.msra.gmra.mxu1 %vm290_vm0, %v244_v25 }
  0xee   :  { %v609_v28 = vpop.f32.mrf.mxu0 }
  0xef   :  { %v246_v31 = vpack.c.bf16 %v609_v28, %v608_v26 }
  0xf0   :  { %v199_v29 = vpop.f32.mrf.mxu0 }
  0xf1   :  { %v245_v30 = vpack.c.bf16 %v199_v29, %v196_v27 }
  0xf2   :  { %v612_v32 = vpop.f32.mrf.mxu0 }
  0xf3   :  { %630 = vmatprep.mubr.msk.bf16.mxu1 %vm290_vm0, %v245_v30 }
  0xf4   :  { %v212_v33 = vpop.f32.mrf.mxu0  ;;  %631 = vmatmul.mubr.msk.bf16.gmra.mxu1 %vm290_vm0, %v246_v31 }
  0xf6   :  { %v613_v34 = vpop.f32.mrf.mxu0 }
  0xf7   :  { %v248_v37 = vpack.c.bf16 %v613_v34, %v612_v32 }
  0xf8   :  { %v215_v35 = vpop.f32.mrf.mxu0 }
  0xf9   :  { %v247_v36 = vpack.c.bf16 %v215_v35, %v212_v33 }
  0xfa   :  { %v616_v38 = vpop.f32.mrf.mxu0 }
  0xfb   :  { %634 = vmatprep.mubr.msk.bf16.mxu1 %vm290_vm0, %v247_v36 }
  0xfc   :  { %v228_v39 = vpop.f32.mrf.mxu0  ;;  %635 = vmatmul.mubr.msk.bf16.gmra.mxu1 %vm290_vm0, %v248_v37 }
  0xfe   :  { %v617_v40 = vpop.f32.mrf.mxu0 }
  0xff   :  { %v250_v43 = vpack.c.bf16 %v617_v40, %v616_v38 }
 0x100   :  { %v231_v41 = vpop.f32.mrf.mxu0 }
 0x101   :  { %v249_v42 = vpack.c.bf16 %v231_v41, %v228_v39 }
 0x103   :  { %638 = vmatprep.mubr.msk.bf16.mxu1 %vm290_vm0, %v249_v42 }
 0x104   :  { %639 = vmatmul.mubr.msk.bf16.gmra.mxu1 %vm290_vm0, %v250_v43 }
 0x1ac   :  { %v628_v45 = vpop.f32.mrf.mxu1 }
 0x1ad   :  { %v358_v46 = vadd.f32 %v628_v45, %v758_v44 }
 0x1ae   :  { %v349_v47 = vpop.f32.mrf.mxu1 }
 0x1af   :  { %v544_v48 = vpack.c.bf16 %v358_v46, %v358_v46  ;;  %v350_v49 = vadd.f32 %v758_v44, %v349_v47 }
 0x1b0   :  { %v629_v50 = vpop.f32.mrf.mxu1 }
 0x1b1   :  { %479 = vst.msk [vmem:[%s844_s4 + $0x8] sm:$0xf] %vm476_vm1, %v544_v48  ;;  %v542_v51 = vpack.c.bf16 %v350_v49, %v350_v49  ;;  %v361_v52 = vadd.f32 %v629_v50, %v758_v44 }
 0x1b2   :  { %v352_v53 = vpop.f32.mrf.mxu1 }
 0x1b3   :  { %477 = vst.msk [vmem:[%s844_s4] sm:$0xf] %vm476_vm1, %v542_v51  ;;  %v545_v54 = vpack.c.bf16 %v361_v52, %v361_v52  ;;  %v353_v55 = vadd.f32 %v758_v44, %v352_v53 }
 0x1b4   :  { %v632_v56 = vpop.f32.mrf.mxu1 }
 0x1b5   :  { %480 = vst.msk [vmem:[%s844_s4 + $0xc] sm:$0xf] %vm476_vm1, %v545_v54  ;;  %v543_v57 = vpack.c.bf16 %v353_v55, %v353_v55  ;;  %v374_v58 = vadd.f32 %v632_v56, %v758_v44 }
 0x1b6   :  { %v365_v59 = vpop.f32.mrf.mxu1 }
 0x1b7   :  { %478 = vst.msk [vmem:[%s844_s4 + $0x4] sm:$0xf] %vm476_vm1, %v543_v57  ;;  %v548_v60 = vpack.c.bf16 %v374_v58, %v374_v58  ;;  %v366_v61 = vadd.f32 %v758_v44, %v365_v59 }
 0x1b8   :  { %v633_v62 = vpop.f32.mrf.mxu1 }
 0x1b9   :  { %483 = vst.msk [vmem:[%s844_s4 + $0x18] sm:$0xf] %vm476_vm1, %v548_v60  ;;  %v546_v63 = vpack.c.bf16 %v366_v61, %v366_v61  ;;  %v377_v0 = vadd.f32 %v633_v62, %v758_v44 }
 0x1ba   :  { %v368_v1 = vpop.f32.mrf.mxu1 }
 0x1bb   :  { %481 = vst.msk [vmem:[%s844_s4 + $0x10] sm:$0xf] %vm476_vm1, %v546_v63  ;;  %v549_v2 = vpack.c.bf16 %v377_v0, %v377_v0  ;;  %v369_v3 = vadd.f32 %v758_v44, %v368_v1 }
 0x1bc   :  { %v636_v4 = vpop.f32.mrf.mxu1 }
 0x1bd   :  { %484 = vst.msk [vmem:[%s844_s4 + $0x1c] sm:$0xf] %vm476_vm1, %v549_v2  ;;  %v547_v5 = vpack.c.bf16 %v369_v3, %v369_v3  ;;  %v390_v6 = vadd.f32 %v636_v4, %v758_v44 }
 0x1be   :  { %v381_v7 = vpop.f32.mrf.mxu1 }
 0x1bf   :  { %482 = vst.msk [vmem:[%s844_s4 + $0x14] sm:$0xf] %vm476_vm1, %v547_v5  ;;  %v552_v8 = vpack.c.bf16 %v390_v6, %v390_v6  ;;  %v382_v9 = vadd.f32 %v758_v44, %v381_v7 }
 0x1c0   :  { %v637_v10 = vpop.f32.mrf.mxu1 }
 0x1c1   :  { %487 = vst.msk [vmem:[%s844_s4 + $0x28] sm:$0xf] %vm476_vm1, %v552_v8  ;;  %v550_v11 = vpack.c.bf16 %v382_v9, %v382_v9  ;;  %v393_v12 = vadd.f32 %v637_v10, %v758_v44 }
 0x1c2   :  { %v384_v13 = vpop.f32.mrf.mxu1 }
 0x1c3   :  { %485 = vst.msk [vmem:[%s844_s4 + $0x20] sm:$0xf] %vm476_vm1, %v550_v11  ;;  %v553_v14 = vpack.c.bf16 %v393_v12, %v393_v12  ;;  %v385_v15 = vadd.f32 %v758_v44, %v384_v13 }
 0x1c4   :  { %v640_v16 = vpop.f32.mrf.mxu1 }
 0x1c5   :  { %488 = vst.msk [vmem:[%s844_s4 + $0x2c] sm:$0xf] %vm476_vm1, %v553_v14  ;;  %v551_v17 = vpack.c.bf16 %v385_v15, %v385_v15  ;;  %v406_v18 = vadd.f32 %v640_v16, %v758_v44 }
 0x1c6   :  { %v397_v19 = vpop.f32.mrf.mxu1 }
 0x1c7   :  { %486 = vst.msk [vmem:[%s844_s4 + $0x24] sm:$0xf] %vm476_vm1, %v551_v17  ;;  %v556_v20 = vpack.c.bf16 %v406_v18, %v406_v18  ;;  %v398_v21 = vadd.f32 %v758_v44, %v397_v19 }
 0x1c8   :  { %v641_v22 = vpop.f32.mrf.mxu1 }
 0x1c9   :  { %491 = vst.msk [vmem:[%s844_s4 + $0x38] sm:$0xf] %vm476_vm1, %v556_v20  ;;  %v554_v23 = vpack.c.bf16 %v398_v21, %v398_v21  ;;  %v409_v24 = vadd.f32 %v641_v22, %v758_v44 }
 0x1ca   :  { %v400_v25 = vpop.f32.mrf.mxu1 }
 0x1cb   :  { %489 = vst.msk [vmem:[%s844_s4 + $0x30] sm:$0xf] %vm476_vm1, %v554_v23  ;;  %v557_v26 = vpack.c.bf16 %v409_v24, %v409_v24  ;;  %v401_v27 = vadd.f32 %v758_v44, %v400_v25 }
 0x1cd   :  { %492 = vst.msk [vmem:[%s844_s4 + $0x3c] sm:$0xf] %vm476_vm1, %v557_v26  ;;  %v555_v28 = vpack.c.bf16 %v401_v27, %v401_v27 }
 0x1cf   :  { %490 = vst.msk [vmem:[%s844_s4 + $0x34] sm:$0xf] %vm476_vm1, %v555_v28 }

// kernel: graph_model_forward.9
= control target key start
LH: loop header
LB: loop body
LE: loop exit
PB: predicated region body
PF: predicated region fallthrough
CT: control target
= control target key end

     0   :  { %v379_v0 = vmov 0.0   ;;  %vm380_vm0 = vmmov 0   ;;  %vm74_vm1 = vcmask 523264   ;;  %vm40_vm2 = vcmask 7168   ;;  %s606_s1 = inlined_call_operand.vmem [shape: f32[64,32], index: 1, kind: input, shape index: {}]   ;;  %s607_s5 = inlined_call_operand.vmem [shape: f32[64,32], index: 5, kind: input, shape index: {}]   ;;  %s608_s0 = inlined_call_operand.vmem [shape: bf16[128,64], index: 0, kind: input, shape index: {}]   ;;  %s609_s4 = inlined_call_operand.<no memory space> [shape: f32[1,1], index: 4, kind: input, shape index: {}]   ;;  %s610_s9 = inlined_call_operand.vmem [shape: f32[128,1], index: 9, kind: output, shape index: {}]   ;;  %s611_s2 = inlined_call_operand.vmem [shape: f32[1,32], index: 2, kind: input, shape index: {}]   ;;  %s612_s6 = inlined_call_operand.vmem [shape: f32[1,32], index: 6, kind: input, shape index: {}]   ;;  %s613_s3 = inlined_call_operand.vmem [shape: f32[1,32], index: 3, kind: input, shape index: {}]   ;;  %s614_s7 = inlined_call_operand.vmem [shape: f32[1,32], index: 7, kind: input, shape index: {}]   ;;  %s615_s8 = inlined_call_operand.<no memory space> [shape: f32[1,1], index: 8, kind: input, shape index: {}]  }
   0x1   :  { %331 = vmatprep.subr.mxu0 %v379_v0  ;;  %v64_v1 = vld [vmem:[%s606_s1 + $0x38] sm:$0xff]  ;;  %350 = vmatprep.subr.mxu1 %v379_v0  ;;  %v63_v2 = vld [vmem:[%s606_s1 + $0x30] sm:$0xff]  ;;  %v62_v5 = vld [vmem:[%s606_s1 + $0x28] sm:$0xff]  ;;  %v14_v20 = vstv %s609_s4  ;;  %vm156_vm3 = vcmask 261120  }
   0x2   :  { %v185_v3 = vld [vmem:[%s607_s5 + $0x38] sm:$0xff]  ;;  %332 = vmatpush3.msra.mxu0 %v64_v1  ;;  %v184_v4 = vld [vmem:[%s607_s5 + $0x30] sm:$0xff]  ;;  %v183_v6 = vld [vmem:[%s607_s5 + $0x28] sm:$0xff]  ;;  %347 = vmatprep.mubr.msk.f32.mxu0 %vm380_vm0, %v379_v0  ;;  %41 = vst.msk [vmem:[%s610_s9] sm:$0xff] %vm40_vm2, %v379_v0 }
   0x3   :  { %351 = vmatpush3.msra.mxu1 %v185_v3  ;;  %333 = vmatprep.subr.mxu0 %v379_v0  ;;  %v61_v7 = vld [vmem:[%s606_s1 + $0x20] sm:$0xff]  ;;  %v60_v9 = vld [vmem:[%s606_s1 + $0x18] sm:$0xff]  ;;  %v59_v11 = vld [vmem:[%s606_s1 + $0x10] sm:$0xff]  ;;  %43 = vst.msk [vmem:[%s610_s9 + $0x10] sm:$0xff] %vm40_vm2, %v379_v0 }
   0x4   :  { %352 = vmatprep.subr.mxu1 %v379_v0  ;;  %334 = vmatpush3.msra.mxu0 %v63_v2  ;;  %v182_v8 = vld [vmem:[%s607_s5 + $0x20] sm:$0xff]  ;;  %v181_v10 = vld [vmem:[%s607_s5 + $0x18] sm:$0xff]  ;;  %v180_v12 = vld [vmem:[%s607_s5 + $0x10] sm:$0xff]  ;;  %44 = vst.msk [vmem:[%s610_s9 + $0x18] sm:$0xff] %vm40_vm2, %v379_v0 }
   0x5   :  { %353 = vmatpush3.msra.mxu1 %v184_v4  ;;  %335 = vmatprep.subr.mxu0 %v379_v0  ;;  %v310_v13 = vld [vmem:[%s608_s0] sm:$0xff]   ;;  %v58_v14 = vld [vmem:[%s606_s1 + $0x8] sm:$0xff]  ;;  %45 = vst.msk [vmem:[%s610_s9 + $0x20] sm:$0xff] %vm40_vm2, %v379_v0  ;;  %46 = vst.msk [vmem:[%s610_s9 + $0x28] sm:$0xff] %vm40_vm2, %v379_v0 }
   0x6   :  { %354 = vmatprep.subr.mxu1 %v379_v0  ;;  %336 = vmatpush3.msra.mxu0 %v62_v5  ;;  %v179_v15 = vld [vmem:[%s607_s5 + $0x8] sm:$0xff]  ;;  %v57_v16 = vld [vmem:[%s606_s1] sm:$0xff]  ;;  %v311_v17 = vunpack.c.l.bf16 %v310_v13  ;;  %v312_v19 = vunpack.c.h.bf16 %v310_v13  ;;  %47 = vst.msk [vmem:[%s610_s9 + $0x30] sm:$0xff] %vm40_vm2, %v379_v0  ;;  %48 = vst.msk [vmem:[%s610_s9 + $0x38] sm:$0xff] %vm40_vm2, %v379_v0 }
   0x7   :  { %355 = vmatpush3.msra.mxu1 %v183_v6  ;;  %337 = vmatprep.subr.mxu0 %v379_v0  ;;  %v178_v18 = vld [vmem:[%s607_s5] sm:$0xff]  ;;  %49 = vst.msk [vmem:[%s610_s9 + $0x40] sm:$0xff] %vm40_vm2, %v379_v0  ;;  %50 = vst.msk [vmem:[%s610_s9 + $0x48] sm:$0xff] %vm40_vm2, %v379_v0  ;;  %v16_v37 = vstv %s615_s8 }
   0x8   :  { %356 = vmatprep.subr.mxu1 %v379_v0  ;;  %338 = vmatpush3.msra.mxu0 %v61_v7  ;;  %51 = vst.msk [vmem:[%s610_s9 + $0x50] sm:$0xff] %vm40_vm2, %v379_v0  ;;  %52 = vst.msk [vmem:[%s610_s9 + $0x58] sm:$0xff] %vm40_vm2, %v379_v0  ;;  %v301_v21 = vld [vmem:[%s611_s2] ss:$0 sm:$0xff] }
   0x9   :  { %357 = vmatpush3.msra.mxu1 %v182_v8  ;;  %339 = vmatprep.subr.mxu0 %v379_v0  ;;  %53 = vst.msk [vmem:[%s610_s9 + $0x60] sm:$0xff] %vm40_vm2, %v379_v0  ;;  %54 = vst.msk [vmem:[%s610_s9 + $0x68] sm:$0xff] %vm40_vm2, %v379_v0  ;;  %v305_v23 = vld [vmem:[%s612_s6] ss:$0 sm:$0xff] }
   0xa   :  { %358 = vmatprep.subr.mxu1 %v379_v0  ;;  %340 = vmatpush3.msra.mxu0 %v60_v9  ;;  %55 = vst.msk [vmem:[%s610_s9 + $0x70] sm:$0xff] %vm40_vm2, %v379_v0  ;;  %56 = vst.msk [vmem:[%s610_s9 + $0x78] sm:$0xff] %vm40_vm2, %v379_v0  ;;  %v303_v27 = vld [vmem:[%s613_s3] ss:$0 sm:$0xff] }
   0xb   :  { %359 = vmatpush3.msra.mxu1 %v181_v10  ;;  %341 = vmatprep.subr.mxu0 %v379_v0  ;;  %42 = vst.msk [vmem:[%s610_s9 + $0x8] sm:$0xff] %vm40_vm2, %v379_v0  ;;  %15 = vst [vmem:[#allocation2] sm:$0x1] %v14_v20  ;;  %v307_v31 = vld [vmem:[%s614_s7] ss:$0 sm:$0xff] }
   0xc   :  { %360 = vmatprep.subr.mxu1 %v379_v0  ;;  %342 = vmatpush3.msra.mxu0 %v59_v11  ;;  %17 = vst [vmem:[#allocation3] sm:$0x1] %v16_v37 }
   0xd   :  { %361 = vmatpush3.msra.mxu1 %v180_v12  ;;  %343 = vmatprep.subr.mxu0 %v379_v0 }
   0xe   :  { %362 = vmatprep.subr.mxu1 %v379_v0  ;;  %344 = vmatpush3.msra.mxu0 %v58_v14 }
   0xf   :  { %345 = vmatprep.subr.mxu0 %v379_v0  ;;  %363 = vmatpush3.msra.mxu1 %v179_v15 }
  0x10   :  { %346 = vmatpush3.msra.mxu0 %v57_v16  ;;  %364 = vmatprep.subr.mxu1 %v379_v0 }
  0x11   :  { %348 = vmatmul.mubr.msk.f32.vlgmr.msra.gmra.mxu0 %vm74_vm1, %v311_v17  ;;  %365 = vmatpush3.msra.mxu1 %v178_v18 }
  0x12   :  { %366 = vmatprep.mubr.msk.f32.mxu1 %vm380_vm0, %v379_v0  ;;  %v304_v38 = vld [vmem:[#allocation2] ss:$0 sm:$0xff] }
  0x13   :  { %367 = vmatmul.mubr.msk.f32.vlgmr.msra.gmra.mxu1 %vm74_vm1, %v312_v19  ;;  %v308_v41 = vld [vmem:[#allocation3] ss:$0 sm:$0xff] }
  0xd1   :  { %v144_v22 = vpop.f32.mrf.mxu0 }
  0xd2   :  { %v145_v24 = vadd.f32 %v301_v21, %v144_v22 }
  0xd3   :  { %v349_v25 = vpop.f32.mrf.mxu0  ;;  %v264_v26 = vpop.f32.mrf.mxu1 }
  0xd4   :  { %v148_v28 = vmax.f32 %v145_v24, 0.0  ;;  %v265_v29 = vadd.f32 %v305_v23, %v264_v26 }
  0xd5   :  { %v368_v30 = vpop.f32.mrf.mxu1 }
  0xd6   :  { %v268_v32 = vmax.f32 %v265_v29, 0.0  ;;  %v155_v33 = vmul.f32 %v303_v27, %v148_v28 }
  0xd8   :  { %v157_v34 = vsel %vm156_vm3, %v155_v33, 0.0  ;;  %v275_v35 = vmul.f32 %v307_v31, %v268_v32 }
  0xd9   :  { %158 = vadd.xlane.f32.xlu0 %v157_v34 }
  0xda   :  { %v276_v36 = vsel %vm156_vm3, %v275_v35, 0.0 }
  0xdd   :  { %277 = vadd.xlane.f32.xlu0 %v276_v36 }
 0x162   :  { %v159_v39 = vpop.xlane.xlu0 %158 }
 0x163   :  { %v166_v40 = vadd.f32 %v304_v38, %v159_v39 }
 0x165   :  { %v167_v42 = vand.u32 2147483647, %v166_v40  ;;  %vm171_vm4 = vcmp.ge.f32.partialorder %v166_v40, 0.0 }
 0x166   :  { %v278_v43 = vpop.xlane.xlu0 %277 }
 0x167   :  { %v168_v44 = vsub.f32 0.0, %v167_v42  ;;  %v285_v45 = vadd.f32 %v308_v41, %v278_v43 }
 0x169   :  { %v169_v46 = vmul.f32 1.442695, %v168_v44  ;;  %v286_v47 = vand.u32 2147483647, %v285_v45  ;;  %vm290_vm5 = vcmp.ge.f32.partialorder %v285_v45, 0.0 }
 0x16b   :  { %371 = vpow2.f32 %v169_v46  ;;  %v287_v48 = vsub.f32 0.0, %v286_v47 }
 0x16d   :  { %v288_v49 = vmul.f32 1.442695, %v287_v48 }
 0x16f   :  { %373 = vpow2.f32 %v288_v49 }
 0x178   :  { %v372_v50 = vpop.eup %371 }
 0x179   :  { %v172_v51 = vadd.f32 1.0, %v372_v50 }
 0x17b   :  { %375 = vrcp.f32 %v172_v51 }
 0x17c   :  { %v374_v52 = vpop.eup %373 }
 0x17d   :  { %v291_v53 = vadd.f32 1.0, %v374_v52 }
 0x17f   :  { %377 = vrcp.f32 %v291_v53 }
 0x188   :  { %v376_v54 = vpop.eup %375 }
 0x189   :  { %v175_v55 = vmul.f32 %v376_v54, %v372_v50 }
 0x18b   :  { %v176_v56 = vsel %vm171_vm4, %v376_v54, %v175_v55 }
 0x18c   :  { %v378_v57 = vpop.eup %377  ;;  %177 = vst.msk [vmem:[%s610_s9] sm:$0xff] %vm40_vm2, %v176_v56 }
 0x18d   :  { %v294_v58 = vmul.f32 %v378_v57, %v374_v52 }
 0x18f   :  { %v295_v59 = vsel %vm290_vm5, %v378_v57, %v294_v58 }
 0x190   :  { %296 = vst.msk [vmem:[%s610_s9 + $0x8] sm:$0xff] %vm40_vm2, %v295_v59 }

</bundles_post_ra>
